<compile_context>
chip_gen: v7x
topology: tpu7x:2x2x1
jax: 0.10.0
libtpu: 0.0.40
codegen_flags: <defaults>
</compile_context>

<pallas_src>
import functools
import math

import jax
import jax.numpy as jnp
from jax.experimental import pallas as pl
from jax.experimental.pallas import tpu as pltpu


_LANE = 128       # lane width: output (H) padding target
_ROW_GRANULE = 16 # row-tile granule (safe for bf16 (16,128) and f32 (8,128) tiling)


def _round_up(x, m):
    return ((x + m - 1) // m) * m


def _vmem_budgets():
    """Generation-aware VMEM limits: (vmem_limit_bytes, per-call tile budget)."""
    cap = None
    try:
        cap = int(pltpu.get_tpu_info().vmem_capacity_bytes)
    except Exception:
        cap = None
    if cap is not None and cap >= 128 * 1024 * 1024:
        # v5e / v6e: 128 MiB physical VMEM per TensorCore
        return 64 * 1024 * 1024, 40 * 1024 * 1024
    # v7x (64 MiB / TC) or unknown: stay conservative, leave double-buffer headroom
    return 48 * 1024 * 1024, 24 * 1024 * 1024


_VMEM_LIMIT_BYTES, _VMEM_TILE_BUDGET = _vmem_budgets()


# ----------------------------- Pallas kernel -------------------------------
def sage_layer_kernel(src_ref, neigh_ref, w_self_ref, w_agg_ref, out_ref, *,
                      num_neighbors, feat_dim, apply_relu):
    """One SageGCN (layer, hop) on a tile of nodes.

    src_ref:    [TM, D]        source-node features (f32 or bf16, true width D)
    neigh_ref:  [TM, K*D]      neighbors of each node, natural row-major layout
    w_self_ref: [D, Hpad]      f32 self-transform weight (rows > true D are 0)
    w_agg_ref:  [D, Hpad]      f32 aggregator weight, pre-scaled by 1/K
    out_ref:    [TM, Hpad]     bf16 (intermediate layers) or f32 (last layer)
    """
    src = src_ref[...].astype(jnp.float32)                       # [TM, D]
    neigh = neigh_ref[...]                                       # [TM, K*D]

    # mean over the K neighbors = f32 sum of K static lane-slices (VPU adds);
    # the 1/K scale is folded into w_agg_ref.
    aggr = neigh[:, 0:feat_dim].astype(jnp.float32)
    for kk in range(1, num_neighbors):
        aggr = aggr + neigh[:, kk * feat_dim:(kk + 1) * feat_dim].astype(jnp.float32)

    # two accumulated MXU matmuls (no [TM, 2D] concat temp), f32 accumulation
    h = jnp.dot(src, w_self_ref[...], preferred_element_type=jnp.float32)
    h = h + jnp.dot(aggr, w_agg_ref[...], preferred_element_type=jnp.float32)

    if apply_relu:                     # activation=F.relu on all but the last layer
        h = jnp.maximum(h, 0.0)
    out_ref[...] = h.astype(out_ref.dtype)


def _choose_tile_m(n_rows, k, d_in, h_pad, in_itemsize, out_itemsize):
    """Largest node tile whose double-buffered footprint fits the VMEM budget."""
    d_vmem = _round_up(d_in, _LANE)          # VMEM lane-pads the true widths
    kd_vmem = _round_up(k * d_in, _LANE)
    per_row = (2 * d_vmem * in_itemsize          # src tile, double-buffered
               + 2 * kd_vmem * in_itemsize       # neigh tile, double-buffered
               + 2 * h_pad * out_itemsize        # out tile, double-buffered
               + (2 * d_vmem + h_pad) * 4)       # f32 temps: src cast, aggr, h
    weight_bytes = 2 * 2 * d_in * h_pad * 4      # 2 resident f32 weights (x2 buffers)
    budget = max(_VMEM_TILE_BUDGET - weight_bytes, per_row * _ROW_GRANULE)

    tm = budget // max(per_row, 1)
    tm = max(_ROW_GRANULE, (tm // _ROW_GRANULE) * _ROW_GRANULE)
    tm = min(tm, 1024)                           # big tiles amortize per-step overhead
    if n_rows >= 512:
        # guarantee >=2 grid blocks so v7x's second TensorCore is not idle
        tm = min(tm, _round_up(-(-n_rows // 2), _ROW_GRANULE))
    if n_rows <= tm:
        return int(n_rows)                       # single full-extent block (always legal)
    return int(tm)


def sage_layer(src, neigh2d, w_self, w_agg_scaled, num_neighbors, apply_relu, out_dtype):
    """src: [N, D]; neigh2d: [N, K*D] (free reshape of [N*K, D]); weights: [D, Hpad] f32."""
    n, d = src.shape
    assert neigh2d.shape == (n, num_neighbors * d)
    h_pad = w_self.shape[1]
    out_itemsize = jnp.dtype(out_dtype).itemsize
    tm = _choose_tile_m(n, num_neighbors, d, h_pad, src.dtype.itemsize, out_itemsize)
    grid = (pl.cdiv(n, tm),)

    kernel = functools.partial(sage_layer_kernel, num_neighbors=num_neighbors,
                               feat_dim=d, apply_relu=apply_relu)

    flops = 4 * n * d * h_pad + n * (num_neighbors - 1) * d
    bytes_accessed = (src.size * src.dtype.itemsize
                      + neigh2d.size * neigh2d.dtype.itemsize
                      + (w_self.size + w_agg_scaled.size) * 4
                      + n * h_pad * out_itemsize)

    return pl.pallas_call(
        kernel,
        out_shape=jax.ShapeDtypeStruct((n, h_pad), out_dtype),
        grid_spec=pltpu.PrefetchScalarGridSpec(
            num_scalar_prefetch=0,
            grid=grid,
            in_specs=[
                pl.BlockSpec((tm, d), lambda i: (i, 0)),                    # src tile
                pl.BlockSpec((tm, num_neighbors * d), lambda i: (i, 0)),    # neigh tile
                pl.BlockSpec(tuple(w_self.shape), lambda i: (0, 0)),        # resident W_self
                pl.BlockSpec(tuple(w_agg_scaled.shape), lambda i: (0, 0)),  # resident W_agg/K
            ],
            out_specs=pl.BlockSpec((tm, h_pad), lambda i: (i, 0)),
        ),
        compiler_params=pltpu.CompilerParams(
            dimension_semantics=("parallel",),
            vmem_limit_bytes=_VMEM_LIMIT_BYTES,
        ),
        cost_estimate=pl.CostEstimate(flops=int(flops), transcendentals=0,
                                      bytes_accessed=int(bytes_accessed)),
    )(src, neigh2d, w_self, w_agg_scaled)


# --------------------------- parameter init --------------------------------
def kaiming_uniform(key, shape):
    # torch.nn.init.kaiming_uniform_ (a=0): bound = sqrt(2) * sqrt(3 / fan_in),
    # with fan_in = shape[1] for a 2-D (in, out) tensor (matches torch's rule).
    fan_in = shape[1]
    bound = math.sqrt(2.0) * math.sqrt(3.0 / fan_in)
    return jax.random.uniform(key, shape, jnp.float32, -bound, bound)


def init_graphsage_params(key, input_dim, hidden_dim):
    """Per-layer (w_self, w_agg, apply_relu) in f32 (module semantics)."""
    dims = [input_dim] + list(hidden_dim)
    num_layers = len(hidden_dim)
    params = []
    for layer in range(num_layers):
        key, k1, k2 = jax.random.split(key, 3)
        w_self = kaiming_uniform(k1, (dims[layer], dims[layer + 1]))
        w_agg = kaiming_uniform(k2, (dims[layer], dims[layer + 1]))
        apply_relu = layer < num_layers - 1      # last SageGCN has activation=None
        params.append((w_self, w_agg, apply_relu))
    return params


def prepare_layer_params(params, num_neighbors_list, input_dim):
    """Pad only the OUTPUT dim to 128 lanes; fold 1/K into w_agg; keep f32 weights.

    Layer l>0 consumes the (padded) hidden width of layer l-1, so its weight
    rows beyond the true hidden width are zero (the padding columns of the
    previous output are exact zeros, so the math is unchanged)."""
    num_layers = len(params)
    prepared = []
    d_in = input_dim
    for l, (w_self, w_agg, apply_relu) in enumerate(params):
        din_true, h = w_self.shape
        h_pad = _round_up(h, _LANE)
        ws = jnp.zeros((d_in, h_pad), jnp.float32).at[:din_true, :h].set(w_self)
        wa = jnp.zeros((d_in, h_pad), jnp.float32).at[:din_true, :h].set(w_agg)
        k_values = sorted({num_neighbors_list[hop] for hop in range(num_layers - l)})
        w_agg_by_k = {k: wa / float(k) for k in k_values}
        prepared.append(dict(w_self=ws, w_agg_by_k=w_agg_by_k, apply_relu=apply_relu,
                             d_in=d_in, h=h, h_pad=h_pad))
        d_in = h_pad
    return prepared


# ----------------------------- forward pass --------------------------------
def graphsage_forward(node_features_list, prepared, num_neighbors_list):
    num_layers = len(num_neighbors_list)
    # raw features are consumed directly (no pre-padding / pre-casting pass)
    hidden = [jnp.asarray(f, jnp.float32) for f in node_features_list]

    for l in range(num_layers):
        layer = prepared[l]
        is_last = l == num_layers - 1
        out_dtype = jnp.float32 if is_last else jnp.bfloat16
        next_hidden = []
        for hop in range(num_layers - l):
            src = hidden[hop]
            k = num_neighbors_list[hop]
            n, d = src.shape
            # natural [n*k, d] neighbor layout -> free row-major reshape to [n, k*d]
            neigh2d = hidden[hop + 1].reshape(n, k * d)
            out = sage_layer(src, neigh2d, layer["w_self"], layer["w_agg_by_k"][k],
                             k, layer["apply_relu"], out_dtype)
            next_hidden.append(out)
        hidden = next_hidden

    # strip the lane padding of the final layer's output
    return hidden[0][:, :prepared[-1]["h"]]


# ------------------------------ references ---------------------------------
def graphsage_ref(node_features_list, params, num_neighbors_list):
    """Pure f32 JAX reference matching the PyTorch module semantics."""
    hidden = list(node_features_list)
    num_layers = len(num_neighbors_list)
    for l in range(num_layers):
        w_self, w_agg, apply_relu = params[l]
        next_hidden = []
        for hop in range(num_layers - l):
            src = hidden[hop]
            n = src.shape[0]
            neigh = hidden[hop + 1].reshape(n, num_neighbors_list[hop], -1)
            h = src @ w_self + jnp.mean(neigh, axis=1) @ w_agg
            if apply_relu:
                h = jnp.maximum(h, 0.0)
            next_hidden.append(h)
        hidden = next_hidden
    return hidden[0]


def graphsage_ref_emul(node_features_list, params, num_neighbors_list):
    """Reference mirroring the kernel numerics: f32 math, sum @ (w_agg/K),
    bf16 storage of intermediate layer activations."""
    hp = jax.lax.Precision.HIGHEST
    num_layers = len(num_neighbors_list)
    hidden = [f.astype(jnp.float32) for f in node_features_list]
    for l in range(num_layers):
        w_self, w_agg, apply_relu = params[l]
        is_last = l == num_layers - 1
        next_hidden = []
        for hop in range(num_layers - l):
            k = num_neighbors_list[hop]
            src = hidden[hop].astype(jnp.float32)
            n = src.shape[0]
            neigh = hidden[hop + 1].astype(jnp.float32).reshape(n, k, -1)
            h = (jnp.dot(src, w_self, precision=hp)
                 + jnp.dot(jnp.sum(neigh, axis=1), w_agg / float(k), precision=hp))
            if apply_relu:
                h = jnp.maximum(h, 0.0)
            next_hidden.append(h if is_last else h.astype(jnp.bfloat16))
        hidden = next_hidden
    return hidden[0]


if __name__ == "__main__":
    # Small GraphSage: 2 layers, input_dim=16, hidden_dim=[32, 16],
    # 4 neighbors sampled per hop, 4 source nodes in the batch.
    input_dim = 16
    hidden_dim = [32, 16]
    num_neighbors_list = [4, 4]
    n_src = 4

    key = jax.random.PRNGKey(0)
    key, kp, k0, k1, k2 = jax.random.split(key, 5)
    params = init_graphsage_params(kp, input_dim, hidden_dim)
    prepared = prepare_layer_params(params, num_neighbors_list, input_dim)

    # node_features_list: [src nodes, 1-hop neighbors, 2-hop neighbors]
    n1 = n_src * num_neighbors_list[0]
    n2 = n1 * num_neighbors_list[1]
    node_features_list = [
        jax.random.normal(k0, (n_src, input_dim), jnp.float32),
        jax.random.normal(k1, (n1, input_dim), jnp.float32),
        jax.random.normal(k2, (n2, input_dim), jnp.float32),
    ]

    out = graphsage_forward(node_features_list, prepared, num_neighbors_list)
    out = jax.block_until_ready(out)
    assert out.shape == (n_src, hidden_dim[-1]), out.shape
    out = jnp.asarray(out, jnp.float32)

    # tight-ish check vs a reference doing the same math (bf16 intermediates,
    # sum @ w_agg/K) — catches tiling / indexing / aggregation bugs
    ref_emul = graphsage_ref_emul(node_features_list, params, num_neighbors_list)
    assert jnp.allclose(out, ref_emul, atol=2e-2, rtol=2e-2), \
        "mismatch vs kernel-numerics-emulating reference"

    # sanity check vs the pure-f32 PyTorch module semantics
    ref_f32 = graphsage_ref(node_features_list, params, num_neighbors_list)
    assert jnp.allclose(out, ref_f32, atol=6e-2, rtol=6e-2), \
        "mismatch vs f32 reference beyond bf16-intermediate tolerance"

    print("KERNEL_OK")
</pallas_src>

<mosaic_0001>
module attributes {stable_mosaic.version = 11 : i64} {
  func.func @sage_layer_kernel(%arg0: i32, %arg1: memref<4x16xf32, #tpu.memory_space<vmem>>, %arg2: memref<4x64xf32, #tpu.memory_space<vmem>>, %arg3: memref<16x128xf32, #tpu.memory_space<vmem>>, %arg4: memref<16x128xf32, #tpu.memory_space<vmem>>, %arg5: memref<4x128xbf16, #tpu.memory_space<vmem>>) attributes {dimension_semantics = [#tpu.dimension_semantics<parallel>], iteration_bounds = array<i64: 1>, scalar_prefetch = 0 : i64, scratch_operands = 0 : i64, tpu.core_type = #tpu.core_type<tc>, window_params = [{transform_indices = @transform_0, window_bounds = array<i64: 4, 16>}, {transform_indices = @transform_1, window_bounds = array<i64: 4, 64>}, {pipeline_mode = #tpu.pipeline_mode<synchronous>, transform_indices = @transform_2, window_bounds = array<i64: 16, 128>}, {pipeline_mode = #tpu.pipeline_mode<synchronous>, transform_indices = @transform_3, window_bounds = array<i64: 16, 128>}, {transform_indices = @transform_4, window_bounds = array<i64: 4, 128>}]} {
    %c0 = arith.constant 0 : index
    %c0_0 = arith.constant 0 : index
    %0 = vector.load %arg1[%c0, %c0_0] : memref<4x16xf32, #tpu.memory_space<vmem>>, vector<4x16xf32>
    %c0_1 = arith.constant 0 : index
    %c0_2 = arith.constant 0 : index
    %1 = vector.load %arg2[%c0_1, %c0_2] : memref<4x64xf32, #tpu.memory_space<vmem>>, vector<4x64xf32>
    %2 = vector.extract_strided_slice %1 {offsets = [0, 0], sizes = [4, 16], strides = [1, 1]} : vector<4x64xf32> to vector<4x16xf32>
    %3 = vector.extract_strided_slice %1 {offsets = [0, 16], sizes = [4, 16], strides = [1, 1]} : vector<4x64xf32> to vector<4x16xf32>
    %4 = arith.addf %2, %3 : vector<4x16xf32>
    %5 = vector.extract_strided_slice %1 {offsets = [0, 32], sizes = [4, 16], strides = [1, 1]} : vector<4x64xf32> to vector<4x16xf32>
    %6 = arith.addf %4, %5 : vector<4x16xf32>
    %7 = vector.extract_strided_slice %1 {offsets = [0, 48], sizes = [4, 16], strides = [1, 1]} : vector<4x64xf32> to vector<4x16xf32>
    %8 = arith.addf %6, %7 : vector<4x16xf32>
    %c0_3 = arith.constant 0 : index
    %c0_4 = arith.constant 0 : index
    %9 = vector.load %arg3[%c0_3, %c0_4] : memref<16x128xf32, #tpu.memory_space<vmem>>, vector<16x128xf32>
    %cst = arith.constant dense<0.000000e+00> : vector<4x128xf32>
    %10 = tpu.matmul %0, %9, %cst {dimension_numbers = #tpu.dot_dimension_numbers<[1], [0], [0], [1], [0, 0, 1, 1], [], []>} : vector<4x16xf32>, vector<16x128xf32>, vector<4x128xf32> -> vector<4x128xf32>
    %c0_5 = arith.constant 0 : index
    %c0_6 = arith.constant 0 : index
    %11 = vector.load %arg4[%c0_5, %c0_6] : memref<16x128xf32, #tpu.memory_space<vmem>>, vector<16x128xf32>
    %cst_7 = arith.constant dense<0.000000e+00> : vector<4x128xf32>
    %12 = tpu.matmul %8, %11, %cst_7 {dimension_numbers = #tpu.dot_dimension_numbers<[1], [0], [0], [1], [0, 0, 1, 1], [], []>} : vector<4x16xf32>, vector<16x128xf32>, vector<4x128xf32> -> vector<4x128xf32>
    %13 = arith.addf %10, %12 : vector<4x128xf32>
    %cst_8 = arith.constant 0.000000e+00 : f32
    %14 = vector.broadcast %cst_8 : f32 to vector<4x128xf32>
    %15 = arith.maximumf %13, %14 : vector<4x128xf32>
    %16 = arith.truncf %15 : vector<4x128xf32> to vector<4x128xbf16>
    %c0_9 = arith.constant 0 : index
    %c0_10 = arith.constant 0 : index
    %17 = vector.load %arg5[%c0_9, %c0_10] : memref<4x128xbf16, #tpu.memory_space<vmem>>, vector<4x128xbf16>
    tpu.vector_store %arg5[%c0_9, %c0_10], %16 {strides = array<i32>} : memref<4x128xbf16, #tpu.memory_space<vmem>>, vector<4x128xbf16>,
    return
  }
  func.func @transform_0(%arg0: i32) -> (i32, i32) {
    %c0_i32 = arith.constant 0 : i32
    %c0_i32_0 = arith.constant 0 : i32
    return %arg0, %c0_i32 : i32, i32
  }
  func.func @transform_1(%arg0: i32) -> (i32, i32) {
    %c0_i32 = arith.constant 0 : i32
    %c0_i32_0 = arith.constant 0 : i32
    return %arg0, %c0_i32 : i32, i32
  }
  func.func @transform_2(%arg0: i32) -> (i32, i32) {
    %c0_i32 = arith.constant 0 : i32
    %c0_i32_0 = arith.constant 0 : i32
    %c0_i32_1 = arith.constant 0 : i32
    return %c0_i32, %c0_i32_0 : i32, i32
  }
  func.func @transform_3(%arg0: i32) -> (i32, i32) {
    %c0_i32 = arith.constant 0 : i32
    %c0_i32_0 = arith.constant 0 : i32
    %c0_i32_1 = arith.constant 0 : i32
    return %c0_i32, %c0_i32_0 : i32, i32
  }
  func.func @transform_4(%arg0: i32) -> (i32, i32) {
    %c0_i32 = arith.constant 0 : i32
    %c0_i32_0 = arith.constant 0 : i32
    return %arg0, %c0_i32 : i32, i32
  }
}

</mosaic_0001>

<bundles_post_ra>
// kernel: tpu_custom_call.1
= control target key start
LH: loop header
LB: loop body
LE: loop exit
PB: predicated region body
PF: predicated region fallthrough
CT: control target
= control target key end

     0   :  { %9 = vsyncpa [#allocation3], 0  ;;  %s513_s0 = inlined_call_operand.hbm [shape: f32[4,16], index: 0, kind: input, shape index: {}]   ;;  %s514_s1 = inlined_call_operand.hbm [shape: f32[4,64], index: 1, kind: input, shape index: {}]   ;;  %s515_s2 = inlined_call_operand.hbm [shape: f32[16,128], index: 2, kind: input, shape index: {}]   ;;  %s516_s3 = inlined_call_operand.hbm [shape: f32[16,128], index: 3, kind: input, shape index: {}]   ;;  %s517_s4 = inlined_call_operand.hbm [shape: bf16[4,128], index: 4, kind: output, shape index: {}]  }
   0x1   :  { %10 = vsyncpa [#allocation6], 0 }
   0x2   :  { %11 = vsyncpa [#allocation9], 0 }
   0x3   :  { %12 = vsyncpa [#allocation4], 0  ;;  %s415_s15 = smov [#allocation5]   ;;  %s416_s17 = smov [#allocation2]  }
   0x4   :  { %s29_s16 = sshll.u32 %s415_s15, 4  ;;  %s19_s18 = sshll.u32 %s416_s17, 4  ;;  %s30_s16 = int_to_ptr.vmem [resolvable:$true] %s29_s16  ;;  %s20_s18 = int_to_ptr.vmem [resolvable:$true] %s19_s18 }
   0x5   :  { %s297_s21 = scalar_lea.hbm %s514_s1, 64 }
   0x6   :  { %p298_p0 = scmp.ne.s32.totalorder %s514_s1, %s297_s21  ;;  %p301_p1 = scmp.lt.u32.totalorder %s297_s21, %s514_s1 }
   0x8   :  { %p303_p2 = pnand %p301_p1, %p298_p0 }
   0xa   :  { %306 = shalt.err (!%p303_p2)
}
   0xb   :  { %s307_s26 = scalar_lea.vmem %s30_s16, 64  ;;  %p312_p4 = scmp.lt.s32.totalorder %s30_s16, %s30_s16 }
   0xc   :  { %p308_p3 = scmp.ne.s32.totalorder %s30_s16, %s307_s26  ;;  %p313_p5 = scmp.lt.s32.totalorder %s307_s26, %s307_s26 }
   0xe   :  { %p314_p6 = por %p313_p5, %p312_p4 }
  0x10   :  { %p315_p7 = pnand %p314_p6, %p308_p3 }
  0x12   :  { %318 = shalt.err (!%p315_p7)
}
  0x13   :  { %32 = dma.hbm_to_vmem [thread:$0]  %s514_s1, 64, %s30_s16, [#allocation6]  }
  0x14   :  { %s319_s5 = scalar_lea.hbm %s513_s0, 64 }
  0x15   :  { %p320_p8 = scmp.ne.s32.totalorder %s513_s0, %s319_s5  ;;  %p323_p9 = scmp.lt.u32.totalorder %s319_s5, %s513_s0 }
  0x17   :  { %p325_p10 = pnand %p323_p9, %p320_p8 }
  0x19   :  { %328 = shalt.err (!%p325_p10)
}
  0x1a   :  { %s329_s10 = scalar_lea.vmem %s20_s18, 64  ;;  %p334_p12 = scmp.lt.s32.totalorder %s20_s18, %s20_s18 }
  0x1b   :  { %p330_p11 = scmp.ne.s32.totalorder %s20_s18, %s329_s10  ;;  %p335_p13 = scmp.lt.s32.totalorder %s329_s10, %s329_s10 }
  0x1d   :  { %p336_p0 = por %p335_p13, %p334_p12 }
  0x1f   :  { %p337_p1 = pnand %p336_p0, %p330_p11 }
  0x21   :  { %340 = shalt.err (!%p337_p1)
}
  0x22   :  { %22 = dma.hbm_to_vmem [thread:$0]  %s513_s0, 64, %s20_s18, [#allocation3]  }
  0x23   :  { %s417_s12 = smov [#allocation7]   ;;  %s341_s16 = scalar_lea.hbm %s515_s2, 256 }
  0x24   :  { %s38_s13 = sshll.u32 %s417_s12, 4  ;;  %p342_p2 = scmp.ne.s32.totalorder %s515_s2, %s341_s16  ;;  %s39_s13 = int_to_ptr.vmem [resolvable:$true] %s38_s13 }
  0x25   :  { %p345_p3 = scmp.lt.u32.totalorder %s341_s16, %s515_s2 }
  0x27   :  { %p347_p4 = pnand %p345_p3, %p342_p2 }
  0x29   :  { %350 = shalt.err (!%p347_p4)
}
  0x2a   :  { %s351_s22 = scalar_lea.vmem %s39_s13, 256  ;;  %p356_p6 = scmp.lt.s32.totalorder %s39_s13, %s39_s13 }
  0x2b   :  { %p352_p5 = scmp.ne.s32.totalorder %s39_s13, %s351_s22  ;;  %p357_p7 = scmp.lt.s32.totalorder %s351_s22, %s351_s22 }
  0x2d   :  { %p358_p8 = por %p357_p7, %p356_p6 }
  0x2f   :  { %p359_p9 = pnand %p358_p8, %p352_p5 }
  0x31   :  { %362 = shalt.err (!%p359_p9)
}
  0x32   :  { %s418_s0 = smov 128   ;;  %s419_s18 = smov 8  }
  0x33   :  { %44 = dma.hbm_to_vmem [thread:$0]  %s515_s2, 256, %s39_s13, [#allocation6], %s418_s0, %s418_s0, %s419_s18  }
  0x34   :  { %s420_s25 = smov [#allocation8]   ;;  %s363_s29 = scalar_lea.hbm %s516_s3, 256 }
  0x35   :  { %s50_s26 = sshll.u32 %s420_s25, 4  ;;  %p364_p10 = scmp.ne.s32.totalorder %s516_s3, %s363_s29  ;;  %s51_s26 = int_to_ptr.vmem [resolvable:$true] %s50_s26 }
  0x36   :  { %p367_p11 = scmp.lt.u32.totalorder %s363_s29, %s516_s3 }
  0x38   :  { %p369_p12 = pnand %p367_p11, %p364_p10 }
  0x3a   :  { %372 = shalt.err (!%p369_p12)
}
  0x3b   :  { %s373_s8 = scalar_lea.vmem %s51_s26, 256  ;;  %p378_p0 = scmp.lt.s32.totalorder %s51_s26, %s51_s26 }
  0x3c   :  { %p374_p13 = scmp.ne.s32.totalorder %s51_s26, %s373_s8  ;;  %p379_p1 = scmp.lt.s32.totalorder %s373_s8, %s373_s8 }
  0x3e   :  { %p380_p2 = por %p379_p1, %p378_p0 }
  0x40   :  { %p381_p3 = pnand %p380_p2, %p374_p13 }
  0x42   :  { %384 = shalt.err (!%p381_p3)
}
  0x43   :  { %56 = dma.hbm_to_vmem [thread:$0]  %s516_s3, 256, %s51_s26, [#allocation9], %s418_s0, %s418_s0, %s419_s18  }
  0x44   :  { %407 = dma.done.wait [#allocation3], 64  }
  0x45   :  { %408 = vsyncadd [#allocation3], 4294967232 }
  0x46   :  { %409 = dma.done.wait [#allocation6], 320  }
  0x47   :  { %410 = vsyncadd [#allocation6], 4294966976 }
  0x48   :  { %411 = dma.done.wait [#allocation9], 256  }
  0x49   :  { %412 = vsyncadd [#allocation9], 4294967040  ;;  %v421_v0 = vmov 0.0|0.0   ;;  %vm422_vm0 = vmmov 0   ;;  %v423_v1 = vmov 0.0   ;;  %v84_v3 = vld [vmem:[#allocation7] sm:$0xff] }
  0x4a   :  { %280 = vmatprep.subr.bf16.mxu0 %v421_v0  ;;  %277 = vmatprep.subr.bf16.mxu1 %v421_v0  ;;  %v70_v2 = vld [vmem:[#allocation5] sm:$0xf]  ;;  %v85_v4 = vld [vmem:[#allocation7 + $0x8] sm:$0xff]  ;;  %s424_s10 = smov 112   ;;  %s425_s1 = smov 80   ;;  %v86_v6 = vld [vmem:[#allocation8] sm:$0xff] }
  0x4b   :  { %274 = vmatprep.mubr.msk.f32.mxu0 %vm422_vm0, %v423_v1  ;;  %267 = vmatprep.mubr.msk.f32.mxu1 %vm422_vm0, %v423_v1  ;;  %v281_v5 = vpack.c.bf16 %v85_v4, %v84_v3  ;;  %v87_v7 = vld [vmem:[#allocation8 + $0x8] sm:$0xff]  ;;  %vm88_vm1 = vcmask 130048   ;;  %s426_s3 = smov 96   ;;  %s427_s11 = smov [#allocation10]  }
  0x4c   :  { %72 = vrot.lane.b32.xlu0 %v70_v2, %s424_s10  ;;  %80 = vrot.lane.b32.xlu1 %v70_v2, %s425_s1  ;;  %v278_v8 = vpack.c.bf16 %v87_v7, %v86_v6  ;;  %v69_v9 = vld [vmem:[#allocation2] sm:$0xf]  ;;  %s244_s12 = sshll.u32 %s427_s11, 4  ;;  %s245_s12 = int_to_ptr.vmem [resolvable:$true] %s244_s12 }
  0x4d   :  { %282 = vmatpush3.bf16.msra.mxu0 %v281_v5  ;;  %s385_s13 = scalar_lea.vmem %s245_s12, 32  ;;  %p390_p5 = scmp.lt.s32.totalorder %s245_s12, %s245_s12 }
  0x4e   :  { %279 = vmatpush3.bf16.msra.mxu1 %v278_v8  ;;  %p386_p4 = scmp.ne.s32.totalorder %s245_s12, %s385_s13  ;;  %p391_p6 = scmp.lt.s32.totalorder %s385_s13, %s385_s13 }
  0x50   :  { %76 = vrot.lane.b32.xlu0 %v70_v2, %s426_s3  ;;  %275 = vmatmul.mubr.msk.f32.vlgmr.msra.gmra.mrb[0].mxu0 %vm88_vm1, %v69_v9  ;;  %p392_p7 = por %p391_p6, %p390_p5 }
  0x52   :  { %p393_p8 = pnand %p392_p7, %p386_p4 }
  0xbe   :  { %v73_v10 = vpop.permute.xlu0 %72  ;;  %v81_v13 = vpop.permute.xlu1 %80 }
  0xbf   :  { %v75_v11 = vadd.f32 %v73_v10, %v70_v2 }
  0xc2   :  { %v77_v12 = vpop.permute.xlu0 %76 }
  0xc3   :  { %v79_v14 = vadd.f32 %v77_v12, %v75_v11 }
  0xc5   :  { %v83_v15 = vadd.f32 %v81_v13, %v79_v14 }
  0xc7   :  { %268 = vmatmul.mubr.msk.f32.vlgmr.msra.gmra.mrb[0].mxu1 %vm88_vm1, %v83_v15 }
 0x123   :  { %v231_v16 = vpop.f32.mrb[0].mxu0 }
 0x124   :  { %v276_v17 = vpop.f32.mrb[1].mxu0 }
 0x19a   :  { %v158_v18 = vpop.f32.mrb[0].mxu1 }
 0x19b   :  { %v232_v19 = vadd.f32 %v231_v16, %v158_v18  ;;  %v269_v20 = vpop.f32.mrb[1].mxu1 }
 0x19d   :  { %v235_v21 = vmax.f32 %v232_v19, 0.0 }
 0x19f   :  { %v236_v22 = vpack.c.bf16 %v235_v21, %v235_v21 }
 0x1a1   :  { %237 = vst [vmem:[#allocation10] sm:$0x3] %v236_v22 }
 0x1a2   :  { %396 = shalt.err (!%p393_p8)
}
 0x1a3   :  { %s397_s16 = scalar_lea.hbm %s517_s4, 32 }
 0x1a4   :  { %p398_p9 = scmp.ne.s32.totalorder %s517_s4, %s397_s16  ;;  %p401_p10 = scmp.lt.u32.totalorder %s397_s16, %s517_s4 }
 0x1a6   :  { %p403_p11 = pnand %p401_p10, %p398_p9 }
 0x1a8   :  { %406 = shalt.err (!%p403_p11)
}
 0x1a9   :  { %247 = dma.vmem_to_hbm [thread:$0]  %s245_s12, 32, %s517_s4, [#allocation4]  }
 0x1aa   :  { %413 = dma.done.wait [#allocation4], 32  }
 0x1ab   :  { %414 = vsyncadd [#allocation4], 4294967264 }
 0x1ac   :  { %251 = vsyncpa [#allocation3], 1 }
 0x1ad   :  { %252 = vsyncpa [#allocation6], 1 }
 0x1ae   :  { %253 = vsyncpa [#allocation9], 1 }
 0x1af   :  { %254 = vsyncpa [#allocation4], 1 }

</bundles_post_ra>
